<compile_context>
chip_gen: v7x
topology: tpu7x:2x2x1
jax: 0.10.0
libtpu: 0.0.40
codegen_flags: <defaults>
</compile_context>

<pallas_src>
import functools

import jax
import jax.numpy as jnp
from jax import lax
from jax.experimental import pallas as pl
from jax.experimental.pallas import tpu as pltpu


def _round_up(n, m):
    return ((n + m - 1) // m) * m


def _vmem_limit_bytes():
    """Scoped-VMEM limit to request: physical capacity minus headroom."""
    try:
        cap = int(pltpu.get_tpu_info().vmem_capacity_bytes)
    except Exception:  # hardware query unavailable on this jax version
        cap = 64 * 1024 * 1024  # conservative (v7x per-TC)
    return max(32 * 1024 * 1024, min(cap - 16 * 1024 * 1024, 112 * 1024 * 1024))


def prepare_generator_weight(weight, compute_dtype=jnp.bfloat16, v_pad=None):
    """One-shot prep of the PyTorch (V, D) weight into an MXU-native (D, V_pad)
    matrix in the matmul compute dtype (fused cast + transpose + pad = a single
    HBM rewrite).  In a real deployment, call this once at module init and
    cache the result so the per-forward weight rewrite disappears."""
    v, d = weight.shape
    if v_pad is None:
        v_pad = v
    wt = jnp.transpose(weight).astype(compute_dtype)      # (D, V)
    if v_pad != v:
        wt = jnp.pad(wt, ((0, 0), (0, v_pad - v)))
    return wt


# ---------------------------------------------------------------------------
# Path A: whole (D, V) weight resident per grid step (small / medium vocab).
# ---------------------------------------------------------------------------
def _fullvocab_kernel(x_ref, wt_ref, o_ref):
    # x_ref: (tile_rows, D) compute dtype ; wt_ref: (D, V) resident weight.
    logits = jnp.dot(x_ref[...], wt_ref[...],
                     preferred_element_type=jnp.float32)
    m = jnp.max(logits, axis=-1, keepdims=True)
    shifted = logits - m
    lse = jnp.log(jnp.sum(jnp.exp(shifted), axis=-1, keepdims=True))
    o_ref[...] = (shifted - lse).astype(o_ref.dtype)


def _fullvocab_call(x2, wt, out_dtype, tile_rows, vmem_limit):
    n_pad, d = x2.shape
    v = wt.shape[1]
    n_tiles = n_pad // tile_rows

    cost = pl.CostEstimate(
        flops=2 * n_pad * d * v,
        transcendentals=n_pad * v,
        bytes_accessed=(x2.size * x2.dtype.itemsize
                        + wt.size * wt.dtype.itemsize
                        + n_pad * v * jnp.dtype(out_dtype).itemsize))

    return pl.pallas_call(
        _fullvocab_kernel,
        out_shape=jax.ShapeDtypeStruct((n_pad, v), out_dtype),
        grid_spec=pltpu.PrefetchScalarGridSpec(
            num_scalar_prefetch=0,
            grid=(n_tiles,),
            in_specs=[
                pl.BlockSpec((tile_rows, d), lambda i: (i, 0)),
                # Constant index_map: the weight block never changes across the
                # grid, so it is not re-DMA'd per row tile.
                pl.BlockSpec((d, v), lambda i: (0, 0)),
            ],
            out_specs=pl.BlockSpec((tile_rows, v), lambda i: (i, 0)),
        ),
        compiler_params=pltpu.CompilerParams(
            dimension_semantics=("parallel",),
            vmem_limit_bytes=vmem_limit),
        cost_estimate=cost,
    )(x2, wt)


# ---------------------------------------------------------------------------
# Path B: streamed-weight single-pass online logsumexp (large vocab).
# ---------------------------------------------------------------------------
def _streamed_kernel(x_ref, wt_ref, o_ref, m_sc, l_sc, *,
                     v_total, tile_v, v_tiles, needs_mask):
    # Grid: (row_tiles, vocab_tiles); vocab is innermost ("arbitrary").
    #   x_ref : (tile_rows, D)   wt_ref : (D, tile_v)   o_ref : (tile_rows, V_pad)
    j = pl.program_id(1)

    @pl.when(j == 0)
    def _init():
        m_sc[...] = jnp.full_like(m_sc, -jnp.inf)
        l_sc[...] = jnp.zeros_like(l_sc)

    logits = jnp.dot(x_ref[...], wt_ref[...],
                     preferred_element_type=jnp.float32)   # (tile_rows, tile_v)

    if needs_mask:
        # Vocab padding only ever occupies a strict suffix of the LAST vocab
        # tile (v_pad - v_total < tile_v, asserted by the wrapper), so the
        # running max never stays at -inf and exp(-inf - -inf) cannot occur.
        col = j * tile_v + lax.broadcasted_iota(jnp.int32, logits.shape, 1)
        logits = jnp.where(col < v_total, logits, -jnp.inf)

    m_prev = m_sc[...]
    m_new = jnp.maximum(m_prev, jnp.max(logits, axis=-1, keepdims=True))
    l_sc[...] = (l_sc[...] * jnp.exp(m_prev - m_new)
                 + jnp.sum(jnp.exp(logits - m_new), axis=-1, keepdims=True))
    m_sc[...] = m_new

    # Stash this vocab tile's un-normalized logits in the resident output row
    # block.  Static column slice selected by a one-hot pl.when per tile index
    # (avoids dynamic lane-dimension indexing).
    logits_cast = logits.astype(o_ref.dtype)
    for jt in range(v_tiles):
        @pl.when(j == jt)
        def _(jt=jt):
            o_ref[:, jt * tile_v:(jt + 1) * tile_v] = logits_cast

    @pl.when(j == v_tiles - 1)
    def _finalize():
        lse = m_sc[...] + jnp.log(l_sc[...])
        o_ref[...] = (o_ref[...].astype(jnp.float32) - lse).astype(o_ref.dtype)


def _streamed_call(x2, wt, out_dtype, tile_rows, tile_v, v_total, vmem_limit):
    n_pad, d = x2.shape
    v_pad = wt.shape[1]
    assert v_pad % tile_v == 0 and v_pad - v_total < tile_v
    n_tiles = n_pad // tile_rows
    v_tiles = v_pad // tile_v
    needs_mask = v_pad != v_total

    cost = pl.CostEstimate(
        flops=2 * n_pad * d * v_pad,
        transcendentals=n_pad * v_pad,
        bytes_accessed=(x2.size * x2.dtype.itemsize
                        + n_tiles * wt.size * wt.dtype.itemsize
                        + n_pad * v_pad * jnp.dtype(out_dtype).itemsize))

    return pl.pallas_call(
        functools.partial(_streamed_kernel, v_total=v_total, tile_v=tile_v,
                          v_tiles=v_tiles, needs_mask=needs_mask),
        out_shape=jax.ShapeDtypeStruct((n_pad, v_pad), out_dtype),
        grid_spec=pltpu.PrefetchScalarGridSpec(
            num_scalar_prefetch=0,
            grid=(n_tiles, v_tiles),
            in_specs=[
                pl.BlockSpec((tile_rows, d), lambda i, j: (i, 0)),
                pl.BlockSpec((d, tile_v), lambda i, j: (0, j)),
            ],
            # Resident across the vocab (reduction) axis: written back once per
            # row tile, lane-dense over the full (padded) vocab.
            out_specs=pl.BlockSpec((tile_rows, v_pad), lambda i, j: (i, 0)),
            scratch_shapes=[
                pltpu.VMEM((tile_rows, 1), jnp.float32),   # running max
                pltpu.VMEM((tile_rows, 1), jnp.float32),   # running sum-exp
            ],
        ),
        compiler_params=pltpu.CompilerParams(
            dimension_semantics=("parallel", "arbitrary"),
            vmem_limit_bytes=vmem_limit),
        cost_estimate=cost,
    )(x2, wt)


# ---------------------------------------------------------------------------
# Public wrapper (forward of the Generator module).
# ---------------------------------------------------------------------------
def generator_forward(x, weight, *, tile_rows=512, tile_v=None,
                      compute_dtype=jnp.bfloat16, out_dtype=None,
                      force_tiled_vocab=False):
    """log_softmax(x @ weight.T, axis=-1); weight is PyTorch layout (vocab, d_model).

    compute_dtype is the MXU input dtype (accumulation and softmax are always
    f32); pass jnp.float32 if full-precision logits are required.  out_dtype
    defaults to x.dtype; pass jnp.bfloat16 to halve the (N, V) log-prob
    writeback if downstream consumers tolerate it.
    """
    orig_shape = x.shape
    d = int(orig_shape[-1])
    v = int(weight.shape[0])
    n = 1
    for s in orig_shape[:-1]:
        n *= int(s)
    if out_dtype is None:
        out_dtype = x.dtype
    out_dtype = jnp.dtype(out_dtype)
    compute_dtype = jnp.dtype(compute_dtype)
    cd_sz = compute_dtype.itemsize
    od_sz = out_dtype.itemsize

    vmem_limit = _vmem_limit_bytes()
    budget = int(0.7 * vmem_limit)

    # v6e/v5e (128 MiB VMEM) can afford bigger streamed weight tiles than v7x.
    if tile_v is None:
        tile_v = 4096 if vmem_limit >= 96 * 1024 * 1024 else 2048
    tile_v = max(128, min(_round_up(int(tile_v), 128), _round_up(v, 128)))

    # Row tile: big for MXU utilization / streamed-weight reuse, clamped to N,
    # multiple of 16 so bf16 sublane packing stays native.
    tile_rows = max(16, min(int(tile_rows), _round_up(n, 16)))

    # Path A VMEM estimate (tightened): double-buffered resident weight (worst
    # case), x / out tile double buffers, f32 logits + shifted temporaries.
    full_vocab_bytes = (2 * d * v * cd_sz
                        + 2 * tile_rows * d * cd_sz
                        + 2 * tile_rows * v * od_sz
                        + 2 * tile_rows * v * 4)
    use_full = (not force_tiled_vocab) and (full_vocab_bytes <= budget)

    x2 = x.reshape(n, d).astype(compute_dtype)

    if use_full:
        # Keep >= 2 row tiles when possible so both v7x TensorCores get work
        # (free here: the resident weight is never re-streamed across row tiles).
        tile_rows = min(tile_rows, max(16, _round_up((n + 1) // 2, 16)))
        n_pad = _round_up(n, tile_rows)
        if n_pad != n:
            x2 = jnp.pad(x2, ((0, n_pad - n), (0, 0)))
        # TODO(synk): cache the prepared weight at module init instead of per call.
        wt = prepare_generator_weight(weight, compute_dtype, v_pad=v)
        out = _fullvocab_call(x2, wt, out_dtype, tile_rows, vmem_limit)
        out = out[:n]
    else:
        # Shrink tiles until the streamed single-pass path fits scoped VMEM.
        def _tiled_bytes(tr, tv):
            vp = _round_up(v, tv)
            return (2 * tr * d * cd_sz          # x row tile (double-buffered)
                    + 2 * d * tv * cd_sz        # streamed weight tile (double-buffered)
                    + 2 * tr * vp * od_sz       # resident output row block
                    + 2 * tr * tv * 4           # f32 logits temporaries
                    + 4 * tr * 4)               # running max / sum-exp scratch
        while (_tiled_bytes(tile_rows, tile_v) > budget
               and (tile_rows > 64 or tile_v > 256)):
            if tile_rows > 64:
                tile_rows = max(64, _round_up(tile_rows // 2, 16))
            else:
                tile_v = max(256, tile_v // 2)
        tile_rows = max(16, min(tile_rows, _round_up(n, 16)))
        v_pad = _round_up(v, tile_v)
        n_pad = _round_up(n, tile_rows)
        if n_pad != n:
            x2 = jnp.pad(x2, ((0, n_pad - n), (0, 0)))
        # TODO(synk): cache the prepared (cast + T + pad) weight at module init.
        wt = prepare_generator_weight(weight, compute_dtype, v_pad=v_pad)
        out = _streamed_call(x2, wt, out_dtype, tile_rows, tile_v, v, vmem_limit)
        out = out[:n, :v]

    return out.reshape(orig_shape[:-1] + (v,))


if __name__ == "__main__":
    # Small shapes consistent with Generator(d_model, vocab).
    B, S, D, V = 2, 8, 32, 128

    key = jax.random.PRNGKey(0)
    kx, kw = jax.random.split(key)
    x = jax.random.normal(kx, (B, S, D), dtype=jnp.float32)
    weight = jax.random.normal(kw, (V, D), dtype=jnp.float32) * (1.0 / jnp.sqrt(D))

    # Path A (full vocab resident, pre-transposed weight).
    out = generator_forward(x, weight)
    out = jax.block_until_ready(out)
    ref = jax.nn.log_softmax(jnp.einsum("bsd,vd->bsv", x, weight), axis=-1)
    assert out.shape == (B, S, V)
    # bf16 matmul inputs (f32 accumulation / softmax) => looser tolerance vs f32 ref.
    assert jnp.allclose(out, ref, atol=5e-2, rtol=5e-2), float(
        jnp.max(jnp.abs(out - ref)))

    # Path B (streamed-weight single-pass online logsumexp, the large-vocab
    # path), exercised at small shapes with ragged N and a vocab that needs
    # padding + masking.
    B2, S2, V2 = 2, 9, 200
    x_b = jax.random.normal(jax.random.PRNGKey(1), (B2, S2, D), dtype=jnp.float32)
    w_b = jax.random.normal(jax.random.PRNGKey(2), (V2, D),
                            dtype=jnp.float32) * (1.0 / jnp.sqrt(D))
    out_b = generator_forward(x_b, w_b, tile_v=128, force_tiled_vocab=True)
    out_b = jax.block_until_ready(out_b)
    ref_b = jax.nn.log_softmax(jnp.einsum("bsd,vd->bsv", x_b, w_b), axis=-1)
    assert out_b.shape == (B2, S2, V2)
    assert jnp.allclose(out_b, ref_b, atol=5e-2, rtol=5e-2), float(
        jnp.max(jnp.abs(out_b - ref_b)))

    # TODO(synk): greedyscore (raw logits, no softmax) can reuse the same
    # kernels with the softmax epilogue dropped; not required for forward().
    print("KERNEL_OK")
</pallas_src>

<mosaic_0001>
module attributes {stable_mosaic.version = 11 : i64} {
  func.func @_fullvocab_kernel(%arg0: i32, %arg1: memref<16x32xbf16, #tpu.memory_space<vmem>>, %arg2: memref<32x128xbf16, #tpu.memory_space<vmem>>, %arg3: memref<16x128xf32, #tpu.memory_space<vmem>>) attributes {dimension_semantics = [#tpu.dimension_semantics<parallel>], iteration_bounds = array<i64: 1>, scalar_prefetch = 0 : i64, scratch_operands = 0 : i64, tpu.core_type = #tpu.core_type<tc>, window_params = [{transform_indices = @transform_0, window_bounds = array<i64: 16, 32>}, {pipeline_mode = #tpu.pipeline_mode<synchronous>, transform_indices = @transform_1, window_bounds = array<i64: 32, 128>}, {transform_indices = @transform_2, window_bounds = array<i64: 16, 128>}]} {
    %c0 = arith.constant 0 : index
    %c0_0 = arith.constant 0 : index
    %0 = vector.load %arg1[%c0, %c0_0] : memref<16x32xbf16, #tpu.memory_space<vmem>>, vector<16x32xbf16>
    %c0_1 = arith.constant 0 : index
    %c0_2 = arith.constant 0 : index
    %1 = vector.load %arg2[%c0_1, %c0_2] : memref<32x128xbf16, #tpu.memory_space<vmem>>, vector<32x128xbf16>
    %cst = arith.constant dense<0.000000e+00> : vector<16x128xf32>
    %2 = tpu.matmul %0, %1, %cst {dimension_numbers = #tpu.dot_dimension_numbers<[1], [0], [0], [1], [0, 0, 1, 1], [], []>} : vector<16x32xbf16>, vector<32x128xbf16>, vector<16x128xf32> -> vector<16x128xf32>
    %cst_3 = arith.constant dense<0xFF800000> : vector<16xf32>
    %3 = vector.multi_reduction <maximumf>, %2, %cst_3 [1] : vector<16x128xf32> to vector<16xf32>
    %4 = vector.shape_cast %3 : vector<16xf32> to vector<16x1xf32>
    %5 = vector.broadcast %4 : vector<16x1xf32> to vector<16x128xf32>
    %6 = arith.subf %2, %5 : vector<16x128xf32>
    %7 = math.exp %6 : vector<16x128xf32>
    %cst_4 = arith.constant dense<0.000000e+00> : vector<16xf32>
    %8 = vector.multi_reduction <add>, %7, %cst_4 [1] : vector<16x128xf32> to vector<16xf32>
    %9 = vector.shape_cast %8 : vector<16xf32> to vector<16x1xf32>
    %10 = math.log %9 : vector<16x1xf32>
    %11 = vector.broadcast %10 : vector<16x1xf32> to vector<16x128xf32>
    %12 = arith.subf %6, %11 : vector<16x128xf32>
    %c0_5 = arith.constant 0 : index
    %c0_6 = arith.constant 0 : index
    %13 = vector.load %arg3[%c0_5, %c0_6] : memref<16x128xf32, #tpu.memory_space<vmem>>, vector<16x128xf32>
    tpu.vector_store %arg3[%c0_5, %c0_6], %12 {strides = array<i32>} : memref<16x128xf32, #tpu.memory_space<vmem>>, vector<16x128xf32>,
    return
  }
  func.func @transform_0(%arg0: i32) -> (i32, i32) {
    %c0_i32 = arith.constant 0 : i32
    %c0_i32_0 = arith.constant 0 : i32
    return %arg0, %c0_i32 : i32, i32
  }
  func.func @transform_1(%arg0: i32) -> (i32, i32) {
    %c0_i32 = arith.constant 0 : i32
    %c0_i32_0 = arith.constant 0 : i32
    %c0_i32_1 = arith.constant 0 : i32
    return %c0_i32, %c0_i32_0 : i32, i32
  }
  func.func @transform_2(%arg0: i32) -> (i32, i32) {
    %c0_i32 = arith.constant 0 : i32
    %c0_i32_0 = arith.constant 0 : i32
    return %arg0, %c0_i32 : i32, i32
  }
}

</mosaic_0001>

<bundles_post_ra>
// kernel: tpu_custom_call.1
= control target key start
LH: loop header
LB: loop body
LE: loop exit
PB: predicated region body
PF: predicated region fallthrough
CT: control target
= control target key end

     0   :  { %7 = vsyncpa [#allocation3], 0  ;;  %s316_s0 = inlined_call_operand.hbm [shape: bf16[16,32], index: 0, kind: input, shape index: {}]   ;;  %s317_s1 = inlined_call_operand.hbm [shape: bf16[32,128], index: 1, kind: input, shape index: {}]   ;;  %s318_s2 = inlined_call_operand.hbm [shape: f32[16,128], index: 2, kind: output, shape index: {}]  }
   0x1   :  { %8 = vsyncpa [#allocation6], 0 }
   0x2   :  { %9 = vsyncpa [#allocation4], 0  ;;  %s256_s9 = smov [#allocation2]   ;;  %s184_s13 = scalar_lea.hbm %s316_s0, 128 }
   0x3   :  { %s15_s10 = sshll.u32 %s256_s9, 4  ;;  %p185_p0 = scmp.ne.s32.totalorder %s316_s0, %s184_s13  ;;  %s16_s10 = int_to_ptr.vmem [resolvable:$true] %s15_s10 }
   0x4   :  { %p188_p1 = scmp.lt.u32.totalorder %s184_s13, %s316_s0 }
   0x6   :  { %p190_p2 = pnand %p188_p1, %p185_p0 }
   0x8   :  { %193 = shalt.err (!%p190_p2)
}
   0x9   :  { %s194_s18 = scalar_lea.vmem %s16_s10, 128  ;;  %p199_p4 = scmp.lt.s32.totalorder %s16_s10, %s16_s10 }
   0xa   :  { %p195_p3 = scmp.ne.s32.totalorder %s16_s10, %s194_s18  ;;  %p200_p5 = scmp.lt.s32.totalorder %s194_s18, %s194_s18 }
   0xc   :  { %p201_p6 = por %p200_p5, %p199_p4 }
   0xe   :  { %p202_p7 = pnand %p201_p6, %p195_p3 }
  0x10   :  { %205 = shalt.err (!%p202_p7)
}
  0x11   :  { %s257_s19 = smov 64   ;;  %s258_s20 = smov 4  }
  0x12   :  { %21 = dma.hbm_to_vmem [thread:$0]  %s316_s0, 128, %s16_s10, [#allocation3], %s257_s19, %s257_s19, %s258_s20  }
  0x13   :  { %s259_s23 = smov [#allocation5]   ;;  %s206_s27 = scalar_lea.hbm %s317_s1, 256 }
  0x14   :  { %s27_s24 = sshll.u32 %s259_s23, 4  ;;  %p207_p8 = scmp.ne.s32.totalorder %s317_s1, %s206_s27  ;;  %s28_s24 = int_to_ptr.vmem [resolvable:$true] %s27_s24 }
  0x15   :  { %p210_p9 = scmp.lt.u32.totalorder %s206_s27, %s317_s1 }
  0x17   :  { %p212_p10 = pnand %p210_p9, %p207_p8 }
  0x19   :  { %215 = shalt.err (!%p212_p10)
}
  0x1a   :  { %s216_s4 = scalar_lea.vmem %s28_s24, 256  ;;  %p221_p12 = scmp.lt.s32.totalorder %s28_s24, %s28_s24 }
  0x1b   :  { %p217_p11 = scmp.ne.s32.totalorder %s28_s24, %s216_s4  ;;  %p222_p13 = scmp.lt.s32.totalorder %s216_s4, %s216_s4 }
  0x1d   :  { %p223_p0 = por %p222_p13, %p221_p12 }
  0x1f   :  { %p224_p1 = pnand %p223_p0, %p217_p11 }
  0x21   :  { %227 = shalt.err (!%p224_p1)
}
  0x22   :  { %33 = dma.hbm_to_vmem [thread:$0]  %s317_s1, 256, %s28_s24, [#allocation6], %s257_s19, %s257_s19, %s258_s20  }
  0x23   :  { %250 = dma.done.wait [#allocation3], 128  }
  0x24   :  { %251 = vsyncadd [#allocation3], 4294967168 }
  0x25   :  { %252 = dma.done.wait [#allocation6], 256  }
  0x26   :  { %253 = vsyncadd [#allocation6], 4294967040  ;;  %v260_v0 = vmov 0.0   ;;  %vm261_vm0 = vmmov 0   ;;  %v173_v1 = vld [vmem:[#allocation5] sm:$0xff]   ;;  %v174_v2 = vld [vmem:[#allocation5 + $0x8] sm:$0xff]  }
  0x27   :  { %156 = vmatprep.subr.bf16.mxu0 %v260_v0  ;;  %160 = vmatprep.mubr.msk.bf16.mxu0 %vm261_vm0, %v260_v0  ;;  %v175_v3 = vld [vmem:[#allocation2] sm:$0xff]   ;;  %vm64_vm1 = vcmask 261120   ;;  %s262_s1 = smov [#allocation7]  }
  0x28   :  { %157 = vmatpush3.bf16.msra.mxu0 %v173_v1  ;;  %s136_s6 = sshll.u32 %s262_s1, 4  ;;  %s137_s6 = int_to_ptr.vmem [resolvable:$true] %s136_s6 }
  0x29   :  { %158 = vmatprep.subr.bf16.mxu0 %v260_v0  ;;  %s228_s7 = scalar_lea.vmem %s137_s6, 256  ;;  %p233_p3 = scmp.lt.s32.totalorder %s137_s6, %s137_s6 }
  0x2a   :  { %p229_p2 = scmp.ne.s32.totalorder %s137_s6, %s228_s7  ;;  %p234_p4 = scmp.lt.s32.totalorder %s228_s7, %s228_s7 }
  0x2c   :  { %159 = vmatpush3.bf16.msra.mxu0 %v174_v2  ;;  %p235_p5 = por %p234_p4, %p233_p3 }
  0x2e   :  { %p236_p6 = pnand %p235_p5, %p229_p2 }
  0x2f   :  { %161 = vmatmul.mubr.msk.bf16.vlgmr.msra.gmra.mrb[0].mxu0 %vm64_vm1, %v175_v3 }
 0x102   :  { %v102_v4 = vpop.f32.mrb[0].mxu0 }
 0x103   :  { %109 = vmax.xlane.f32.xlu0 %v102_v4  ;;  %v162_v5 = vpop.f32.mrb[1].mxu0 }
 0x104   :  { %v105_v6 = vpop.f32.mrb[2].mxu0 }
 0x105   :  { %v163_v7 = vpop.f32.mrb[3].mxu0 }
 0x107   :  { %111 = vmax.xlane.f32.xlu0 %v105_v6 }
 0x190   :  { %v110_v8 = vpop.xlane.xlu0 %109 }
 0x191   :  { %v113_v9 = vsub.f32 %v102_v4, %v110_v8 }
 0x193   :  { %v115_v10 = vmul.f32 1.442695, %v113_v9 }
 0x194   :  { %v112_v11 = vpop.xlane.xlu0 %111 }
 0x195   :  { %v114_v12 = vsub.f32 %v105_v6, %v112_v11  ;;  %176 = vpow2.f32 %v115_v10 }
 0x197   :  { %v117_v13 = vmul.f32 1.442695, %v114_v12 }
 0x199   :  { %178 = vpow2.f32 %v117_v13 }
 0x19f   :  { %v177_v14 = vpop.eup %176 }
 0x1a0   :  { %119 = vadd.xlane.f32.xlu1 %v177_v14 }
 0x1a3   :  { %v179_v15 = vpop.eup %178 }
 0x1a4   :  { %121 = vadd.xlane.f32.xlu1 %v179_v15 }
 0x22d   :  { %v120_v16 = vpop.xlane.xlu1 %119 }
 0x22e   :  { %180 = vlog2.f32 %v120_v16 }
 0x231   :  { %v122_v17 = vpop.xlane.xlu1 %121 }
 0x232   :  { %182 = vlog2.f32 %v122_v17 }
 0x238   :  { %v181_v18 = vpop.eup %180 }
 0x239   :  { %v124_v19 = vmul.f32 0.6931472, %v181_v18 }
 0x23b   :  { %v127_v20 = vsub.f32 %v113_v9, %v124_v19 }
 0x23c   :  { %v183_v21 = vpop.eup %182 }
 0x23d   :  { %129 = vst [vmem:[#allocation7] sm:$0xff] %v127_v20  ;;  %v126_v22 = vmul.f32 0.6931472, %v183_v21 }
 0x23f   :  { %v128_v23 = vsub.f32 %v114_v12, %v126_v22 }
 0x241   :  { %130 = vst [vmem:[#allocation7 + $0x8] sm:$0xff] %v128_v23 }
 0x242   :  { %239 = shalt.err (!%p236_p6)
}
 0x243   :  { %s240_s10 = scalar_lea.hbm %s318_s2, 256 }
 0x244   :  { %p241_p7 = scmp.ne.s32.totalorder %s318_s2, %s240_s10  ;;  %p244_p8 = scmp.lt.u32.totalorder %s240_s10, %s318_s2 }
 0x246   :  { %p246_p9 = pnand %p244_p8, %p241_p7 }
 0x248   :  { %249 = shalt.err (!%p246_p9)
}
 0x249   :  { %s263_s15 = smov 128   ;;  %s264_s16 = smov 8  }
 0x24a   :  { %142 = dma.vmem_to_hbm [thread:$0]  %s137_s6, 256, %s318_s2, [#allocation4], %s263_s15, %s263_s15, %s264_s16  }
 0x24b   :  { %254 = dma.done.wait [#allocation4], 256  }
 0x24c   :  { %255 = vsyncadd [#allocation4], 4294967040 }
 0x24d   :  { %146 = vsyncpa [#allocation3], 1 }
 0x24e   :  { %147 = vsyncpa [#allocation6], 1 }
 0x24f   :  { %148 = vsyncpa [#allocation4], 1 }

</bundles_post_ra>
